<compile_context>
chip_gen: v7x
topology: tpu7x:2x2x1
jax: 0.10.0
libtpu: 0.0.40
codegen_flags: <defaults>
</compile_context>

<pallas_src>
import functools
import math

import jax
import jax.numpy as jnp
import numpy as np
from jax.experimental import pallas as pl
from jax.experimental.pallas import tpu as pltpu


_WEIGHT_ORDER = (
    "wqkv_t", "bqkv", "wo_t", "bo",
    "w1_t", "b1", "w2_t", "b2",
    "g1", "be1", "g2", "be2",
)


def _layer_norm(h, gamma, beta, eps=1e-6):
    mu = jnp.mean(h, axis=-1, keepdims=True)
    var = jnp.mean((h - mu) ** 2, axis=-1, keepdims=True)
    return (h - mu) * jax.lax.rsqrt(var + eps) * gamma + beta


def _encoder_layer_kernel(nhead, batch,
                          x_ref,
                          wqkv_ref, bqkv_ref, wo_ref, bo_ref,
                          w1_ref, b1_ref, w2_ref, b2_ref,
                          g1_ref, be1_ref, g2_ref, be2_ref,
                          o_ref):
    H, B = nhead, batch
    N, D = x_ref.shape
    hd = D // H
    mmdt = wqkv_ref.dtype                      # MXU operand dtype (bf16 or f32)

    x = x_ref[...].astype(jnp.float32)         # (N, D); residual / LN math in f32

    # ---- fused QKV projection: one (N,D)@(D,3D) matmul, f32 accumulation ----
    qkv = jnp.dot(x.astype(mmdt), wqkv_ref[...],
                  preferred_element_type=jnp.float32) + bqkv_ref[...]   # (N, 3D)
    q, k, v = qkv[:, :D], qkv[:, D:2 * D], qkv[:, 2 * D:]               # lane slices

    # Split heads only where needed (score / PV matmuls).  At this toy hd(=8)
    # the per-head lanes are padding-heavy; at production hd=128 these slices
    # are naturally lane-dense.
    def to_heads(t):                           # (N, D) -> (H, N, hd)
        return jnp.stack([t[:, h * hd:(h + 1) * hd] for h in range(H)], axis=0)

    q3, k3, v3 = to_heads(q), to_heads(k), to_heads(v)

    # ---- attention, all heads batched; cross-batch pairs masked in-kernel ----
    s = jnp.einsum("hik,hjk->hij", q3.astype(mmdt), k3.astype(mmdt),
                   preferred_element_type=jnp.float32)                  # (H, N, N)
    row = jax.lax.broadcasted_iota(jnp.int32, (N, N), 0)
    col = jax.lax.broadcasted_iota(jnp.int32, (N, N), 1)
    mask = jnp.where((row % B) == (col % B), 0.0, -1e30)                # block-diag
    s = s + mask[None, :, :]
    s = s - jnp.max(s, axis=-1, keepdims=True)
    p = jnp.exp(s)
    p = p * pl.reciprocal(jnp.sum(p, axis=-1, keepdims=True), approx=True)
    attn3 = jnp.einsum("hij,hjk->hik", p.astype(mmdt), v3.astype(mmdt),
                       preferred_element_type=jnp.float32)              # (H, N, hd)

    # ---- out projection: merge heads along lanes, one K=D matmul ----
    attn_nd = jnp.concatenate([attn3[h] for h in range(H)], axis=-1)    # (N, D)
    attn_out = jnp.dot(attn_nd.astype(mmdt), wo_ref[...],
                       preferred_element_type=jnp.float32) + bo_ref[...]

    # TODO(synk): dropout1 / dropout / dropout2 are identity (inference mode).
    h1 = _layer_norm(x + attn_out, g1_ref[...], be1_ref[...])

    # ---- feed-forward: linear1 -> ReLU -> linear2 (pre-transposed weights) ----
    f = jnp.dot(h1.astype(mmdt), w1_ref[...],
                preferred_element_type=jnp.float32) + b1_ref[...]
    f = jnp.maximum(f, 0.0)
    f2 = jnp.dot(f.astype(mmdt), w2_ref[...],
                 preferred_element_type=jnp.float32) + b2_ref[...]

    out = _layer_norm(h1 + f2, g2_ref[...], be2_ref[...])
    o_ref[...] = out.astype(o_ref.dtype)


def _prepare_weights(params, nhead, compute_dtype):
    """One-time parameter prep: QKV fused + pre-transposed, Q-scale folded."""
    D = params["wo"].shape[0]
    hd = D // nhead
    scale = 1.0 / math.sqrt(hd)

    # Fold 1/sqrt(head_dim) into the Q columns of the fused, transposed weight
    # and into the Q bias (bias stays f32, so the fold is exact there).
    col_scale = jnp.concatenate(
        [jnp.full((D,), scale, jnp.float32), jnp.ones((2 * D,), jnp.float32)])
    wqkv_t = params["wqkv"].T.astype(jnp.float32) * col_scale[None, :]   # (D, 3D)
    bqkv = (params["bqkv"].astype(jnp.float32) * col_scale).reshape(1, 3 * D)

    prep = dict(
        wqkv_t=wqkv_t, bqkv=bqkv,
        wo_t=params["wo"].T, bo=params["bo"].reshape(1, D),
        w1_t=params["w1"].T, b1=params["b1"].reshape(1, -1),
        w2_t=params["w2"].T, b2=params["b2"].reshape(1, D),
        g1=params["g1"].reshape(1, D), be1=params["be1"].reshape(1, D),
        g2=params["g2"].reshape(1, D), be2=params["be2"].reshape(1, D),
    )
    mm = {"wqkv_t", "wo_t", "w1_t", "w2_t"}          # MXU-facing operands
    return {k: v.astype(compute_dtype if k in mm else jnp.float32)
            for k, v in prep.items()}


def transformer_encoder_layer(src, params, nhead, compute_dtype=jnp.bfloat16):
    """src: (S, B, D) PyTorch seq-first layout.  Returns (S, B, D)."""
    S, B, D = src.shape
    N = S * B
    x2d = src.reshape(N, D)        # contiguous view: row r = token (s=r//B, b=r%B)

    prep = _prepare_weights(params, nhead, compute_dtype)
    weights = [prep[k] for k in _WEIGHT_ORDER]

    vmem = pl.BlockSpec(memory_space=pltpu.MemorySpace.VMEM)
    out = pl.pallas_call(
        functools.partial(_encoder_layer_kernel, nhead, B),
        out_shape=jax.ShapeDtypeStruct((N, D), src.dtype),
        in_specs=[vmem] * (1 + len(weights)),
        out_specs=vmem,
        # TODO(synk): at production sizes (D>=1024, FF>=4096, S>=512) re-tile:
        #  * keep weights VMEM-resident and stream x/out in 512-1024 row tiles
        #    via a grid with a "parallel" row axis (keeps both v7x TCs busy);
        #  * do attention per batch element / kv tile (flash style) instead of
        #    flattened-batch (S*B)^2 scores;
        #  * set pltpu.CompilerParams(vmem_limit_bytes=...) per generation
        #    (v5e scoped default 16 MiB; v7x only 64 MiB physical).
    )(x2d, *weights)

    return out.reshape(S, B, D)


def _reference(src, params, nhead):
    """Pure-JAX reference mirroring the PyTorch module (dropout = identity)."""
    S, B, D = src.shape
    hd = D // nhead
    x = src.astype(jnp.float32)                              # (S, B, D)

    qkv = jnp.einsum("sbd,ed->sbe", x, params["wqkv"]) + params["bqkv"]
    q, k, v = qkv[..., :D], qkv[..., D:2 * D], qkv[..., 2 * D:]

    def split(t):                      # (S, B, D) -> (B, H, S, hd)
        return t.reshape(S, B, nhead, hd).transpose(1, 2, 0, 3)

    qh, kh, vh = split(q) / math.sqrt(hd), split(k), split(v)
    s = jnp.einsum("bhqd,bhkd->bhqk", qh, kh)
    p = jax.nn.softmax(s, axis=-1)
    attn = jnp.einsum("bhqk,bhkd->bhqd", p, vh)
    attn = attn.transpose(2, 0, 1, 3).reshape(S, B, D)
    attn = jnp.einsum("sbd,ed->sbe", attn, params["wo"]) + params["bo"]

    def ln(h, g, b):
        mu = jnp.mean(h, -1, keepdims=True)
        var = jnp.mean((h - mu) ** 2, -1, keepdims=True)
        return (h - mu) / jnp.sqrt(var + 1e-6) * g + b

    h1 = ln(x + attn, params["g1"], params["be1"])
    f = jnp.maximum(jnp.einsum("sbd,fd->sbf", h1, params["w1"]) + params["b1"], 0.0)
    f = jnp.einsum("sbf,df->sbd", f, params["w2"]) + params["b2"]
    return ln(h1 + f, params["g2"], params["be2"])


if __name__ == "__main__":
    # Shapes implied by the module: seq=8, batch=2, d_model=32, nhead=4, ff=64.
    S, B, D, H, FF = 8, 2, 32, 4, 64
    key = jax.random.PRNGKey(0)
    ks = jax.random.split(key, 13)

    src = jax.random.normal(ks[0], (S, B, D), dtype=jnp.float32)
    params = {
        "wqkv": 0.1 * jax.random.normal(ks[1], (3 * D, D), jnp.float32),
        "bqkv": 0.05 * jax.random.normal(ks[2], (3 * D,), jnp.float32),
        "wo":   0.1 * jax.random.normal(ks[3], (D, D), jnp.float32),
        "bo":   0.05 * jax.random.normal(ks[4], (D,), jnp.float32),
        "w1":   0.1 * jax.random.normal(ks[5], (FF, D), jnp.float32),
        "b1":   0.05 * jax.random.normal(ks[6], (FF,), jnp.float32),
        "w2":   0.1 * jax.random.normal(ks[7], (D, FF), jnp.float32),
        "b2":   0.05 * jax.random.normal(ks[8], (D,), jnp.float32),
        "g1":   1.0 + 0.1 * jax.random.normal(ks[9], (D,), jnp.float32),
        "be1":  0.05 * jax.random.normal(ks[10], (D,), jnp.float32),
        "g2":   1.0 + 0.1 * jax.random.normal(ks[11], (D,), jnp.float32),
        "be2":  0.05 * jax.random.normal(ks[12], (D,), jnp.float32),
    }

    ref = jax.block_until_ready(_reference(src, params, H))

    # f32-operand run: tight parity with the PyTorch-equivalent reference.
    out_f32 = jax.block_until_ready(
        transformer_encoder_layer(src, params, H, compute_dtype=jnp.float32))
    assert out_f32.shape == (S, B, D)
    np.testing.assert_allclose(np.asarray(out_f32), np.asarray(ref),
                               rtol=1e-3, atol=1e-3)

    # bf16-operand run (default, native MXU path): bf16-appropriate tolerance.
    out_bf16 = jax.block_until_ready(transformer_encoder_layer(src, params, H))
    assert out_bf16.shape == (S, B, D)
    np.testing.assert_allclose(np.asarray(out_bf16), np.asarray(ref),
                               rtol=2e-2, atol=2e-2)

    print("KERNEL_OK")
</pallas_src>

<mosaic_0001>
module attributes {stable_mosaic.version = 11 : i64} {
  func.func @_encoder_layer_kernel(%arg0: memref<16x32xf32, #tpu.memory_space<vmem>>, %arg1: memref<32x96xf32, #tpu.memory_space<vmem>>, %arg2: memref<1x96xf32, #tpu.memory_space<vmem>>, %arg3: memref<32x32xf32, #tpu.memory_space<vmem>>, %arg4: memref<1x32xf32, #tpu.memory_space<vmem>>, %arg5: memref<32x64xf32, #tpu.memory_space<vmem>>, %arg6: memref<1x64xf32, #tpu.memory_space<vmem>>, %arg7: memref<64x32xf32, #tpu.memory_space<vmem>>, %arg8: memref<1x32xf32, #tpu.memory_space<vmem>>, %arg9: memref<1x32xf32, #tpu.memory_space<vmem>>, %arg10: memref<1x32xf32, #tpu.memory_space<vmem>>, %arg11: memref<1x32xf32, #tpu.memory_space<vmem>>, %arg12: memref<1x32xf32, #tpu.memory_space<vmem>>, %arg13: memref<16x32xf32, #tpu.memory_space<vmem>>) attributes {dimension_semantics = [], scalar_prefetch = 0 : i64, scratch_operands = 0 : i64, tpu.core_type = #tpu.core_type<tc>} {
    %c0 = arith.constant 0 : index
    %c0_0 = arith.constant 0 : index
    %0 = vector.load %arg0[%c0, %c0_0] : memref<16x32xf32, #tpu.memory_space<vmem>>, vector<16x32xf32>
    %c0_1 = arith.constant 0 : index
    %c0_2 = arith.constant 0 : index
    %1 = vector.load %arg1[%c0_1, %c0_2] : memref<32x96xf32, #tpu.memory_space<vmem>>, vector<32x96xf32>
    %cst = arith.constant dense<0.000000e+00> : vector<16x96xf32>
    %2 = tpu.matmul %0, %1, %cst {dimension_numbers = #tpu.dot_dimension_numbers<[1], [0], [0], [1], [0, 0, 1, 1], [], []>} : vector<16x32xf32>, vector<32x96xf32>, vector<16x96xf32> -> vector<16x96xf32>
    %c0_3 = arith.constant 0 : index
    %c0_4 = arith.constant 0 : index
    %3 = vector.load %arg2[%c0_3, %c0_4] : memref<1x96xf32, #tpu.memory_space<vmem>>, vector<1x96xf32>
    %4 = vector.broadcast %3 : vector<1x96xf32> to vector<16x96xf32>
    %5 = arith.addf %2, %4 : vector<16x96xf32>
    %6 = vector.extract_strided_slice %5 {offsets = [0, 0], sizes = [16, 32], strides = [1, 1]} : vector<16x96xf32> to vector<16x32xf32>
    %7 = vector.extract_strided_slice %5 {offsets = [0, 32], sizes = [16, 32], strides = [1, 1]} : vector<16x96xf32> to vector<16x32xf32>
    %8 = vector.extract_strided_slice %5 {offsets = [0, 64], sizes = [16, 32], strides = [1, 1]} : vector<16x96xf32> to vector<16x32xf32>
    %9 = vector.extract_strided_slice %6 {offsets = [0, 0], sizes = [16, 8], strides = [1, 1]} : vector<16x32xf32> to vector<16x8xf32>
    %10 = vector.extract_strided_slice %6 {offsets = [0, 8], sizes = [16, 8], strides = [1, 1]} : vector<16x32xf32> to vector<16x8xf32>
    %11 = vector.extract_strided_slice %6 {offsets = [0, 16], sizes = [16, 8], strides = [1, 1]} : vector<16x32xf32> to vector<16x8xf32>
    %12 = vector.extract_strided_slice %6 {offsets = [0, 24], sizes = [16, 8], strides = [1, 1]} : vector<16x32xf32> to vector<16x8xf32>
    %13 = vector.shape_cast %9 : vector<16x8xf32> to vector<1x16x8xf32>
    %14 = vector.shape_cast %10 : vector<16x8xf32> to vector<1x16x8xf32>
    %15 = vector.shape_cast %11 : vector<16x8xf32> to vector<1x16x8xf32>
    %16 = vector.shape_cast %12 : vector<16x8xf32> to vector<1x16x8xf32>
    %17 = tpu.concatenate %13, %14, %15, %16 in 0 : vector<1x16x8xf32>, vector<1x16x8xf32>, vector<1x16x8xf32>, vector<1x16x8xf32> -> vector<4x16x8xf32>
    %18 = vector.extract_strided_slice %7 {offsets = [0, 0], sizes = [16, 8], strides = [1, 1]} : vector<16x32xf32> to vector<16x8xf32>
    %19 = vector.extract_strided_slice %7 {offsets = [0, 8], sizes = [16, 8], strides = [1, 1]} : vector<16x32xf32> to vector<16x8xf32>
    %20 = vector.extract_strided_slice %7 {offsets = [0, 16], sizes = [16, 8], strides = [1, 1]} : vector<16x32xf32> to vector<16x8xf32>
    %21 = vector.extract_strided_slice %7 {offsets = [0, 24], sizes = [16, 8], strides = [1, 1]} : vector<16x32xf32> to vector<16x8xf32>
    %22 = vector.shape_cast %18 : vector<16x8xf32> to vector<1x16x8xf32>
    %23 = vector.shape_cast %19 : vector<16x8xf32> to vector<1x16x8xf32>
    %24 = vector.shape_cast %20 : vector<16x8xf32> to vector<1x16x8xf32>
    %25 = vector.shape_cast %21 : vector<16x8xf32> to vector<1x16x8xf32>
    %26 = tpu.concatenate %22, %23, %24, %25 in 0 : vector<1x16x8xf32>, vector<1x16x8xf32>, vector<1x16x8xf32>, vector<1x16x8xf32> -> vector<4x16x8xf32>
    %27 = vector.extract_strided_slice %8 {offsets = [0, 0], sizes = [16, 8], strides = [1, 1]} : vector<16x32xf32> to vector<16x8xf32>
    %28 = vector.extract_strided_slice %8 {offsets = [0, 8], sizes = [16, 8], strides = [1, 1]} : vector<16x32xf32> to vector<16x8xf32>
    %29 = vector.extract_strided_slice %8 {offsets = [0, 16], sizes = [16, 8], strides = [1, 1]} : vector<16x32xf32> to vector<16x8xf32>
    %30 = vector.extract_strided_slice %8 {offsets = [0, 24], sizes = [16, 8], strides = [1, 1]} : vector<16x32xf32> to vector<16x8xf32>
    %31 = vector.shape_cast %27 : vector<16x8xf32> to vector<1x16x8xf32>
    %32 = vector.shape_cast %28 : vector<16x8xf32> to vector<1x16x8xf32>
    %33 = vector.shape_cast %29 : vector<16x8xf32> to vector<1x16x8xf32>
    %34 = vector.shape_cast %30 : vector<16x8xf32> to vector<1x16x8xf32>
    %35 = tpu.concatenate %31, %32, %33, %34 in 0 : vector<1x16x8xf32>, vector<1x16x8xf32>, vector<1x16x8xf32>, vector<1x16x8xf32> -> vector<4x16x8xf32>
    "tpu.trace_start"() <{level = 10 : i32, message = "hik,hjk->hij"}> : () -> ()
    %cst_5 = arith.constant dense<0.000000e+00> : vector<4x16x16xf32>
    %36 = tpu.matmul %17, %26, %cst_5 {dimension_numbers = #tpu.dot_dimension_numbers<[2], [2], [1], [1], [0, 0, 0, 1, 1, 1], [0], [0]>} : vector<4x16x8xf32>, vector<4x16x8xf32>, vector<4x16x16xf32> -> vector<4x16x16xf32>
    "tpu.trace_stop"() : () -> ()
    %37 = tpu.iota {dimensions = array<i32: 0>} : vector<16x16xi32>
    %38 = tpu.iota {dimensions = array<i32: 1>} : vector<16x16xi32>
    %c2_i32 = arith.constant 2 : i32
    %c0_i32 = arith.constant 0 : i32
    %39 = arith.cmpi eq, %c2_i32, %c0_i32 : i32
    %c1_i32 = arith.constant 1 : i32
    %40 = arith.select %39, %c1_i32, %c2_i32 : i32
    %41 = vector.broadcast %40 : i32 to vector<16x16xi32>
    %42 = arith.remsi %37, %41 : vector<16x16xi32>
    %c0_i32_6 = arith.constant 0 : i32
    %43 = vector.broadcast %c0_i32_6 : i32 to vector<16x16xi32>
    %44 = arith.cmpi ne, %42, %43 : vector<16x16xi32>
    %c0_i32_7 = arith.constant 0 : i32
    %45 = vector.broadcast %c0_i32_7 : i32 to vector<16x16xi32>
    %46 = arith.cmpi slt, %42, %45 : vector<16x16xi32>
    %c0_i32_8 = arith.constant 0 : i32
    %47 = arith.cmpi slt, %40, %c0_i32_8 : i32
    %48 = vector.broadcast %47 : i1 to vector<16x16xi1>
    %49 = vector.broadcast %48 : vector<16x16xi1> to vector<16x16xi1>
    %50 = arith.xori %46, %49 : vector<16x16xi1>
    %51 = arith.andi %50, %44 : vector<16x16xi1>
    %52 = vector.broadcast %40 : i32 to vector<16x16xi32>
    %53 = arith.addi %42, %52 : vector<16x16xi32>
    %54 = arith.select %51, %53, %42 : vector<16x16xi1>, vector<16x16xi32>
    %c2_i32_9 = arith.constant 2 : i32
    %c0_i32_10 = arith.constant 0 : i32
    %55 = arith.cmpi eq, %c2_i32_9, %c0_i32_10 : i32
    %c1_i32_11 = arith.constant 1 : i32
    %56 = arith.select %55, %c1_i32_11, %c2_i32_9 : i32
    %57 = vector.broadcast %56 : i32 to vector<16x16xi32>
    %58 = arith.remsi %38, %57 : vector<16x16xi32>
    %c0_i32_12 = arith.constant 0 : i32
    %59 = vector.broadcast %c0_i32_12 : i32 to vector<16x16xi32>
    %60 = arith.cmpi ne, %58, %59 : vector<16x16xi32>
    %c0_i32_13 = arith.constant 0 : i32
    %61 = vector.broadcast %c0_i32_13 : i32 to vector<16x16xi32>
    %62 = arith.cmpi slt, %58, %61 : vector<16x16xi32>
    %c0_i32_14 = arith.constant 0 : i32
    %63 = arith.cmpi slt, %56, %c0_i32_14 : i32
    %64 = vector.broadcast %63 : i1 to vector<16x16xi1>
    %65 = vector.broadcast %64 : vector<16x16xi1> to vector<16x16xi1>
    %66 = arith.xori %62, %65 : vector<16x16xi1>
    %67 = arith.andi %66, %60 : vector<16x16xi1>
    %68 = vector.broadcast %56 : i32 to vector<16x16xi32>
    %69 = arith.addi %58, %68 : vector<16x16xi32>
    %70 = arith.select %67, %69, %58 : vector<16x16xi1>, vector<16x16xi32>
    %71 = arith.cmpi eq, %54, %70 : vector<16x16xi32>
    %cst_15 = arith.constant 0.000000e+00 : f32
    %cst_16 = arith.constant -1.000000e+30 : f32
    %72 = vector.broadcast %cst_15 : f32 to vector<16x16xf32>
    %73 = vector.broadcast %cst_16 : f32 to vector<16x16xf32>
    %74 = arith.select %71, %72, %73 : vector<16x16xi1>, vector<16x16xf32>
    %75 = vector.shape_cast %74 : vector<16x16xf32> to vector<1x16x16xf32>
    %76 = vector.broadcast %75 : vector<1x16x16xf32> to vector<4x16x16xf32>
    %77 = arith.addf %36, %76 : vector<4x16x16xf32>
    %cst_17 = arith.constant dense<0xFF800000> : vector<4x16xf32>
    %78 = vector.multi_reduction <maximumf>, %77, %cst_17 [2] : vector<4x16x16xf32> to vector<4x16xf32>
    %79 = vector.shape_cast %78 : vector<4x16xf32> to vector<4x16x1xf32>
    %80 = vector.broadcast %79 : vector<4x16x1xf32> to vector<4x16x16xf32>
    %81 = arith.subf %77, %80 : vector<4x16x16xf32>
    %82 = math.exp %81 : vector<4x16x16xf32>
    %cst_18 = arith.constant dense<0.000000e+00> : vector<4x16xf32>
    %83 = vector.multi_reduction <add>, %82, %cst_18 [2] : vector<4x16x16xf32> to vector<4x16xf32>
    %84 = vector.shape_cast %83 : vector<4x16xf32> to vector<4x16x1xf32>
    %85 = tpu.reciprocal %84 {approx = true} : vector<4x16x1xf32> -> vector<4x16x1xf32>
    %86 = vector.broadcast %85 : vector<4x16x1xf32> to vector<4x16x16xf32>
    %87 = arith.mulf %82, %86 : vector<4x16x16xf32>
    "tpu.trace_start"() <{level = 10 : i32, message = "hij,hjk->hik"}> : () -> ()
    %cst_19 = arith.constant dense<0.000000e+00> : vector<4x16x8xf32>
    %88 = tpu.matmul %87, %35, %cst_19 {dimension_numbers = #tpu.dot_dimension_numbers<[2], [1], [1], [2], [0, 0, 0, 1, 1, 2], [0], [0]>} : vector<4x16x16xf32>, vector<4x16x8xf32>, vector<4x16x8xf32> -> vector<4x16x8xf32>
    "tpu.trace_stop"() : () -> ()
    %89 = vector.extract_strided_slice %88 {offsets = [0, 0, 0], sizes = [1, 16, 8], strides = [1, 1, 1]} : vector<4x16x8xf32> to vector<1x16x8xf32>
    %90 = vector.shape_cast %89 : vector<1x16x8xf32> to vector<16x8xf32>
    %91 = vector.extract_strided_slice %88 {offsets = [1, 0, 0], sizes = [1, 16, 8], strides = [1, 1, 1]} : vector<4x16x8xf32> to vector<1x16x8xf32>
    %92 = vector.shape_cast %91 : vector<1x16x8xf32> to vector<16x8xf32>
    %93 = vector.extract_strided_slice %88 {offsets = [2, 0, 0], sizes = [1, 16, 8], strides = [1, 1, 1]} : vector<4x16x8xf32> to vector<1x16x8xf32>
    %94 = vector.shape_cast %93 : vector<1x16x8xf32> to vector<16x8xf32>
    %95 = vector.extract_strided_slice %88 {offsets = [3, 0, 0], sizes = [1, 16, 8], strides = [1, 1, 1]} : vector<4x16x8xf32> to vector<1x16x8xf32>
    %96 = vector.shape_cast %95 : vector<1x16x8xf32> to vector<16x8xf32>
    %97 = tpu.concatenate %90, %92, %94, %96 in 1 : vector<16x8xf32>, vector<16x8xf32>, vector<16x8xf32>, vector<16x8xf32> -> vector<16x32xf32>
    %c0_20 = arith.constant 0 : index
    %c0_21 = arith.constant 0 : index
    %98 = vector.load %arg3[%c0_20, %c0_21] : memref<32x32xf32, #tpu.memory_space<vmem>>, vector<32x32xf32>
    %cst_22 = arith.constant dense<0.000000e+00> : vector<16x32xf32>
    %99 = tpu.matmul %97, %98, %cst_22 {dimension_numbers = #tpu.dot_dimension_numbers<[1], [0], [0], [1], [0, 0, 1, 1], [], []>} : vector<16x32xf32>, vector<32x32xf32>, vector<16x32xf32> -> vector<16x32xf32>
    %c0_23 = arith.constant 0 : index
    %c0_24 = arith.constant 0 : index
    %100 = vector.load %arg4[%c0_23, %c0_24] : memref<1x32xf32, #tpu.memory_space<vmem>>, vector<1x32xf32>
    %101 = vector.broadcast %100 : vector<1x32xf32> to vector<16x32xf32>
    %102 = arith.addf %99, %101 : vector<16x32xf32>
    %103 = arith.addf %0, %102 : vector<16x32xf32>
    %c0_25 = arith.constant 0 : index
    %c0_26 = arith.constant 0 : index
    %104 = vector.load %arg9[%c0_25, %c0_26] : memref<1x32xf32, #tpu.memory_space<vmem>>, vector<1x32xf32>
    %c0_27 = arith.constant 0 : index
    %c0_28 = arith.constant 0 : index
    %105 = vector.load %arg10[%c0_27, %c0_28] : memref<1x32xf32, #tpu.memory_space<vmem>>, vector<1x32xf32>
    %cst_29 = arith.constant dense<0.000000e+00> : vector<16xf32>
    %106 = vector.multi_reduction <add>, %103, %cst_29 [1] : vector<16x32xf32> to vector<16xf32>
    %107 = vector.shape_cast %106 : vector<16xf32> to vector<16x1xf32>
    %cst_30 = arith.constant 3.200000e+01 : f32
    %108 = vector.broadcast %cst_30 : f32 to vector<16x1xf32>
    %109 = arith.divf %107, %108 : vector<16x1xf32>
    %110 = vector.broadcast %109 : vector<16x1xf32> to vector<16x32xf32>
    %111 = arith.subf %103, %110 : vector<16x32xf32>
    %112 = arith.mulf %111, %111 : vector<16x32xf32>
    %cst_31 = arith.constant dense<0.000000e+00> : vector<16xf32>
    %113 = vector.multi_reduction <add>, %112, %cst_31 [1] : vector<16x32xf32> to vector<16xf32>
    %114 = vector.shape_cast %113 : vector<16xf32> to vector<16x1xf32>
    %cst_32 = arith.constant 3.200000e+01 : f32
    %115 = vector.broadcast %cst_32 : f32 to vector<16x1xf32>
    %116 = arith.divf %114, %115 : vector<16x1xf32>
    %117 = vector.broadcast %109 : vector<16x1xf32> to vector<16x32xf32>
    %118 = arith.subf %103, %117 : vector<16x32xf32>
    %cst_33 = arith.constant 9.99999997E-7 : f32
    %119 = vector.broadcast %cst_33 : f32 to vector<16x1xf32>
    %120 = arith.addf %116, %119 : vector<16x1xf32>
    %121 = math.rsqrt %120 : vector<16x1xf32>
    %122 = vector.broadcast %121 : vector<16x1xf32> to vector<16x32xf32>
    %123 = arith.mulf %118, %122 : vector<16x32xf32>
    %124 = vector.broadcast %104 : vector<1x32xf32> to vector<16x32xf32>
    %125 = arith.mulf %123, %124 : vector<16x32xf32>
    %126 = vector.broadcast %105 : vector<1x32xf32> to vector<16x32xf32>
    %127 = arith.addf %125, %126 : vector<16x32xf32>
    %c0_34 = arith.constant 0 : index
    %c0_35 = arith.constant 0 : index
    %128 = vector.load %arg5[%c0_34, %c0_35] : memref<32x64xf32, #tpu.memory_space<vmem>>, vector<32x64xf32>
    %cst_36 = arith.constant dense<0.000000e+00> : vector<16x64xf32>
    %129 = tpu.matmul %127, %128, %cst_36 {dimension_numbers = #tpu.dot_dimension_numbers<[1], [0], [0], [1], [0, 0, 1, 1], [], []>} : vector<16x32xf32>, vector<32x64xf32>, vector<16x64xf32> -> vector<16x64xf32>
    %c0_37 = arith.constant 0 : index
    %c0_38 = arith.constant 0 : index
    %130 = vector.load %arg6[%c0_37, %c0_38] : memref<1x64xf32, #tpu.memory_space<vmem>>, vector<1x64xf32>
    %131 = vector.broadcast %130 : vector<1x64xf32> to vector<16x64xf32>
    %132 = arith.addf %129, %131 : vector<16x64xf32>
    %cst_39 = arith.constant 0.000000e+00 : f32
    %133 = vector.broadcast %cst_39 : f32 to vector<16x64xf32>
    %134 = arith.maximumf %132, %133 : vector<16x64xf32>
    %c0_40 = arith.constant 0 : index
    %c0_41 = arith.constant 0 : index
    %135 = vector.load %arg7[%c0_40, %c0_41] : memref<64x32xf32, #tpu.memory_space<vmem>>, vector<64x32xf32>
    %cst_42 = arith.constant dense<0.000000e+00> : vector<16x32xf32>
    %136 = tpu.matmul %134, %135, %cst_42 {dimension_numbers = #tpu.dot_dimension_numbers<[1], [0], [0], [1], [0, 0, 1, 1], [], []>} : vector<16x64xf32>, vector<64x32xf32>, vector<16x32xf32> -> vector<16x32xf32>
    %c0_43 = arith.constant 0 : index
    %c0_44 = arith.constant 0 : index
    %137 = vector.load %arg8[%c0_43, %c0_44] : memref<1x32xf32, #tpu.memory_space<vmem>>, vector<1x32xf32>
    %138 = vector.broadcast %137 : vector<1x32xf32> to vector<16x32xf32>
    %139 = arith.addf %136, %138 : vector<16x32xf32>
    %140 = arith.addf %127, %139 : vector<16x32xf32>
    %c0_45 = arith.constant 0 : index
    %c0_46 = arith.constant 0 : index
    %141 = vector.load %arg11[%c0_45, %c0_46] : memref<1x32xf32, #tpu.memory_space<vmem>>, vector<1x32xf32>
    %c0_47 = arith.constant 0 : index
    %c0_48 = arith.constant 0 : index
    %142 = vector.load %arg12[%c0_47, %c0_48] : memref<1x32xf32, #tpu.memory_space<vmem>>, vector<1x32xf32>
    %cst_49 = arith.constant dense<0.000000e+00> : vector<16xf32>
    %143 = vector.multi_reduction <add>, %140, %cst_49 [1] : vector<16x32xf32> to vector<16xf32>
    %144 = vector.shape_cast %143 : vector<16xf32> to vector<16x1xf32>
    %cst_50 = arith.constant 3.200000e+01 : f32
    %145 = vector.broadcast %cst_50 : f32 to vector<16x1xf32>
    %146 = arith.divf %144, %145 : vector<16x1xf32>
    %147 = vector.broadcast %146 : vector<16x1xf32> to vector<16x32xf32>
    %148 = arith.subf %140, %147 : vector<16x32xf32>
    %149 = arith.mulf %148, %148 : vector<16x32xf32>
    %cst_51 = arith.constant dense<0.000000e+00> : vector<16xf32>
    %150 = vector.multi_reduction <add>, %149, %cst_51 [1] : vector<16x32xf32> to vector<16xf32>
    %151 = vector.shape_cast %150 : vector<16xf32> to vector<16x1xf32>
    %cst_52 = arith.constant 3.200000e+01 : f32
    %152 = vector.broadcast %cst_52 : f32 to vector<16x1xf32>
    %153 = arith.divf %151, %152 : vector<16x1xf32>
    %154 = vector.broadcast %146 : vector<16x1xf32> to vector<16x32xf32>
    %155 = arith.subf %140, %154 : vector<16x32xf32>
    %cst_53 = arith.constant 9.99999997E-7 : f32
    %156 = vector.broadcast %cst_53 : f32 to vector<16x1xf32>
    %157 = arith.addf %153, %156 : vector<16x1xf32>
    %158 = math.rsqrt %157 : vector<16x1xf32>
    %159 = vector.broadcast %158 : vector<16x1xf32> to vector<16x32xf32>
    %160 = arith.mulf %155, %159 : vector<16x32xf32>
    %161 = vector.broadcast %141 : vector<1x32xf32> to vector<16x32xf32>
    %162 = arith.mulf %160, %161 : vector<16x32xf32>
    %163 = vector.broadcast %142 : vector<1x32xf32> to vector<16x32xf32>
    %164 = arith.addf %162, %163 : vector<16x32xf32>
    %c0_54 = arith.constant 0 : index
    %c0_55 = arith.constant 0 : index
    %165 = vector.load %arg13[%c0_54, %c0_55] : memref<16x32xf32, #tpu.memory_space<vmem>>, vector<16x32xf32>
    tpu.vector_store %arg13[%c0_54, %c0_55], %164 {strides = array<i32>} : memref<16x32xf32, #tpu.memory_space<vmem>>, vector<16x32xf32>,
    return
  }
}

</mosaic_0001>

<bundles_post_ra>
// kernel: tpu_custom_call.1
= control target key start
LH: loop header
LB: loop body
LE: loop exit
PB: predicated region body
PF: predicated region fallthrough
CT: control target
= control target key end

     0   :  { %18 = vsyncpa [#allocation3], 0  ;;  %s2165_s0 = inlined_call_operand.hbm [shape: f32[16,32], index: 0, kind: input, shape index: {}]   ;;  %s2166_s1 = inlined_call_operand.vmem [shape: f32[32,96], index: 1, kind: input, shape index: {}]   ;;  %s2167_s2 = inlined_call_operand.vmem [shape: f32[1,96], index: 2, kind: input, shape index: {}]   ;;  %s2168_s3 = inlined_call_operand.vmem [shape: f32[32,32], index: 3, kind: input, shape index: {}]   ;;  %s2169_s4 = inlined_call_operand.vmem [shape: f32[1,32], index: 4, kind: input, shape index: {}]   ;;  %s2170_s5 = inlined_call_operand.vmem [shape: f32[32,64], index: 5, kind: input, shape index: {}]   ;;  %s2171_s6 = inlined_call_operand.vmem [shape: f32[1,64], index: 6, kind: input, shape index: {}]   ;;  %s2172_s7 = inlined_call_operand.vmem [shape: f32[64,32], index: 7, kind: input, shape index: {}]   ;;  %s2173_s8 = inlined_call_operand.vmem [shape: f32[1,32], index: 8, kind: input, shape index: {}]   ;;  %s2174_s9 = inlined_call_operand.vmem [shape: f32[1,32], index: 9, kind: input, shape index: {}]   ;;  %s2175_s10 = inlined_call_operand.vmem [shape: f32[1,32], index: 10, kind: input, shape index: {}]   ;;  %s2176_s11 = inlined_call_operand.vmem [shape: f32[1,32], index: 11, kind: input, shape index: {}]   ;;  %s2177_s12 = inlined_call_operand.vmem [shape: f32[1,32], index: 12, kind: input, shape index: {}]   ;;  %s2178_s13 = inlined_call_operand.hbm [shape: f32[16,32], index: 13, kind: output, shape index: {}]  }
   0x1   :  { %19 = vsyncpa [#allocation4], 0  ;;  %s1853_s25 = smov [#allocation2]   ;;  %s1805_s29 = scalar_lea.hbm %s2165_s0, 256 }
   0x2   :  { %s25_s26 = sshll.u32 %s1853_s25, 4  ;;  %p1806_p0 = scmp.ne.s32.totalorder %s2165_s0, %s1805_s29  ;;  %s26_s26 = int_to_ptr.vmem [resolvable:$true] %s25_s26 }
   0x3   :  { %p1809_p1 = scmp.lt.u32.totalorder %s1805_s29, %s2165_s0 }
   0x5   :  { %p1811_p2 = pnand %p1809_p1, %p1806_p0 }
   0x7   :  { %1814 = shalt.err (!%p1811_p2)
}
   0x8   :  { %s1815_s17 = scalar_lea.vmem %s26_s26, 256  ;;  %p1820_p4 = scmp.lt.s32.totalorder %s26_s26, %s26_s26 }
   0x9   :  { %p1816_p3 = scmp.ne.s32.totalorder %s26_s26, %s1815_s17  ;;  %p1821_p5 = scmp.lt.s32.totalorder %s1815_s17, %s1815_s17 }
   0xb   :  { %p1822_p6 = por %p1821_p5, %p1820_p4 }
   0xd   :  { %p1823_p7 = pnand %p1822_p6, %p1816_p3 }
   0xf   :  { %1826 = shalt.err (!%p1823_p7)
}
  0x10   :  { %s1854_s18 = smov 128   ;;  %s1855_s19 = smov 8  }
  0x11   :  { %31 = dma.hbm_to_vmem [thread:$0]  %s2165_s0, 256, %s26_s26, [#allocation3], %s1854_s18, %s1854_s18, %s1855_s19  }
  0x12   :  { %1849 = dma.done.wait [#allocation3], 256  }
  0x13   :  { %1850 = vsyncadd [#allocation3], 4294967040  ;;  %vm72_vm0 = vcmask 261120   ;;  %v61_v0 = vld [vmem:[%s2166_s1] sm:$0xff]  ;;  %v62_v1 = vld [vmem:[%s2166_s1 + $0x8] sm:$0xff]  ;;  %vm217_vm1 = vcmask 64512   ;;  %v168_v40 = vlaneseq }
  0x14   :  { %v63_v2 = vld [vmem:[%s2166_s1 + $0x10] sm:$0xff]  ;;  %v1633_v3 = vpack.c.bf16 %v62_v1, %v61_v0  ;;  %v64_v4 = vld [vmem:[%s2166_s1 + $0x18] sm:$0xff]  ;;  %v1962_v5 = vld [vmem:[#allocation2] sm:$0xff]  ;;  %s1856_s1 = smov 112   ;;  %s1857_s14 = smov 120   ;;  %vm562_vm5 = vcmask 130048  }
  0x15   :  { %v1637_v6 = vpack.c.bf16 %v64_v4, %v63_v2  ;;  %1533 = vmatprep.mubr.msk.f32.mxu1 %vm72_vm0, %v1962_v5  ;;  %v1966_v7 = vld [vmem:[#allocation2 + $0x8] sm:$0xff]  ;;  %v1425_v8 = vld [vmem:[%s2167_s2] ss:$0 sm:$0xff]  ;;  %s1858_s15 = smov 104   ;;  %s1859_s16 = smov 96   ;;  %vm1989_vm2 = vmpackc.low %vm217_vm1, %vm217_vm1  ;;  %v169_v41 = vshrl.u32 %v168_v40, 7 }
  0x16   :  { %1634 = vmatprep.subr.bf16.mxu1 %v1633_v3  ;;  %v172_v43 = vand.u32 127, %v168_v40  ;;  %v1860_v47 = vmov -1e+30   ;;  %s1861_s2 = smov 64   ;;  %s1862_s28 = smov 16   ;;  %vm1027_vm6 = vcmask 195584  }
  0x17   :  { %1636 = vmatpush3.bf16.msra.mxu1 %v1633_v3  ;;  %v170_v42 = vadd.s32 8, %v169_v41  ;;  %v177_v46 = vand.u32 1, %v169_v41  ;;  %s1863_s29 = smov 24   ;;  %vm1278_vm7 = vcmask 523264   ;;  %s1864_s21 = smov [#allocation5]  }
  0x18   :  { %1638 = vmatprep.subr.bf16.mxu1 %v1637_v6  ;;  %v201_v45 = vand.u32 1, %v172_v43  ;;  %s1413_s22 = sshll.u32 %s1864_s21, 4  ;;  %s1414_s22 = int_to_ptr.vmem [resolvable:$true] %s1413_s22 }
  0x19   :  { %v184_v44 = vand.u32 1, %v170_v42  ;;  %s1827_s23 = scalar_lea.vmem %s1414_s22, 256  ;;  %p1832_p9 = scmp.lt.s32.totalorder %s1414_s22, %s1414_s22 }
  0x1a   :  { %vm209_vm4 = vcmp.eq.s32.totalorder %v177_v46, %v201_v45  ;;  %p1828_p8 = scmp.ne.s32.totalorder %s1414_s22, %s1827_s23  ;;  %p1833_p10 = scmp.lt.s32.totalorder %s1827_s23, %s1827_s23 }
  0x1b   :  { %1640 = vmatpush3.bf16.msra.mxu1 %v1637_v6  ;;  %vm210_vm3 = vcmp.eq.s32.totalorder %v184_v44, %v201_v45  ;;  %v211_v49 = vsel %vm209_vm4, 0.0, %v1860_v47 }
  0x1c   :  { %v212_v48 = vsel %vm210_vm3, 0.0, %v1860_v47  ;;  %p1834_p11 = por %p1833_p10, %p1832_p9 }
  0x1e   :  { %1534 = vmatmul.mubr.msk.f32.vlgmr.msra.gmra.mrb[0].mxu1 %vm72_vm0, %v1966_v7  ;;  %p1835_p12 = pnand %p1834_p11, %p1828_p8 }
  0xf1   :  { %v1535_v9 = vpop.f32.mrb[0].mxu1 }
  0xf2   :  { %v151_v10 = vadd.f32 %v1535_v9, %v1425_v8  ;;  %v145_v11 = vpop.f32.mrb[1].mxu1 }
  0xf3   :  { %v146_v12 = vadd.f32 %v1425_v8, %v145_v11 }
  0xf4   :  { %162 = vrot.lane.b32.xlu1 %v151_v10, %s1856_s1 }
  0xf5   :  { %156 = vrot.lane.b32.xlu0 %v146_v12, %s1857_s14  ;;  %1540 = vmatprep.mubr.msk.f32.mxu1 %vm217_vm1, %v146_v12  ;;  %v1974_v13 = vpack.i.bf16 %v151_v10, %v146_v12 }
  0xf8   :  { %160 = vrot.lane.b32.xlu1 %v146_v12, %s1856_s1 }
  0xf9   :  { %158 = vrot.lane.b32.xlu0 %v151_v10, %s1857_s14 }
  0xfc   :  { %166 = vrot.lane.b32.xlu1 %v151_v10, %s1858_s15 }
  0xfd   :  { %164 = vrot.lane.b32.xlu0 %v146_v12, %s1858_s15 }
 0x101   :  { %1726 = vrot.lane.b32.xlu0 %v1974_v13, %s1859_s16 }
 0x166   :  { %v163_v14 = vpop.permute.xlu1 %162 }
 0x167   :  { %v157_v15 = vpop.permute.xlu0 %156 }
 0x168   :  { %1547 = vmatprep.mubr.msk.f32.mxu0 %vm217_vm1, %v157_v15 }
 0x16a   :  { %v161_v16 = vpop.permute.xlu1 %160 }
 0x16b   :  { %v1978_v17 = vpack.i.bf16 %v163_v14, %v161_v16  ;;  %v159_v18 = vpop.permute.xlu0 %158 }
 0x16c   :  { %v1980_v19 = vpack.i.bf16 %v159_v18, %v157_v15 }
 0x16d   :  { %1736 = vrot.lane.b32.xlu0 %v1978_v17, %s1859_s16 }
 0x16e   :  { %v167_v20 = vpop.permute.xlu1 %166  ;;  %1731 = vrot.lane.b32.xlu1 %v1980_v19, %s1859_s16 }
 0x16f   :  { %v165_v21 = vpop.permute.xlu0 %164 }
 0x170   :  { %v1984_v22 = vpack.i.bf16 %v167_v20, %v165_v21 }
 0x172   :  { %1741 = vrot.lane.b32.xlu1 %v1984_v22, %s1859_s16 }
 0x173   :  { %v1727_v23 = vpop.permute.xlu0 %1726 }
 0x174   :  { %v1729_v24 = vunpack.i.h.bf16 %v1727_v23  ;;  %v1728_v25 = vunpack.i.l.bf16 %v1727_v23 }
 0x176   :  { %v1641_v27 = vpack.c.bf16 %v1729_v24, %v1728_v25 }
 0x178   :  { %1643 = vmatprep.subr.msk.bf16.mxu1 %vm1989_vm2, %v1641_v27 }
 0x179   :  { %1646 = vmatpush3.bf16.xpose.msk.msra.mxu1 %vm1989_vm2, %v1641_v27 }
 0x180   :  { %1541 = vmatmul.mubr.msk.f32.vlgmr.msra.gmra.mrb[2].mxu1 %vm217_vm1, %v151_v10 }
 0x181   :  { %1554 = vmatprep.mubr.msk.f32.mxu1 %vm217_vm1, %v161_v16 }
 0x1df   :  { %v1737_v28 = vpop.permute.xlu0 %1736 }
 0x1e0   :  { %v1739_v29 = vunpack.i.h.bf16 %v1737_v28  ;;  %v1738_v30 = vunpack.i.l.bf16 %v1737_v28  ;;  %v1732_v31 = vpop.permute.xlu1 %1731 }
 0x1e1   :  { %v1734_v32 = vunpack.i.h.bf16 %v1732_v31  ;;  %v1733_v33 = vunpack.i.l.bf16 %v1732_v31 }
 0x1e2   :  { %v1653_v34 = vpack.c.bf16 %v1739_v29, %v1738_v30 }
 0x1e3   :  { %v1647_v35 = vpack.c.bf16 %v1734_v32, %v1733_v33 }
 0x1e4   :  { %v1742_v36 = vpop.permute.xlu1 %1741  ;;  %1655 = vmatprep.subr.msk.bf16.mxu1 %vm1989_vm2, %v1653_v34 }
 0x1e5   :  { %v1744_v37 = vunpack.i.h.bf16 %v1742_v36  ;;  %v1743_v38 = vunpack.i.l.bf16 %v1742_v36  ;;  %1649 = vmatprep.subr.msk.bf16.mxu0 %vm1989_vm2, %v1647_v35  ;;  %1658 = vmatpush3.bf16.xpose.msk.msra.mxu1 %vm1989_vm2, %v1653_v34 }
 0x1e6   :  { %1652 = vmatpush3.bf16.xpose.msk.msra.mxu0 %vm1989_vm2, %v1647_v35 }
 0x1e7   :  { %v1659_v39 = vpack.c.bf16 %v1744_v37, %v1743_v38 }
 0x1e9   :  { %1661 = vmatprep.subr.msk.bf16.mxu0 %vm1989_vm2, %v1659_v39 }
 0x1ec   :  { %1555 = vmatmul.mubr.msk.f32.vlgmr.msra.gmra.mrb[4].mxu1 %vm217_vm1, %v163_v14 }
 0x1ed   :  { %1548 = vmatmul.mubr.msk.f32.vlgmr.msra.gmra.mrb[0].mxu0 %vm217_vm1, %v159_v18 }
 0x1ee   :  { %1664 = vmatpush3.bf16.xpose.msk.msra.mxu0 %vm1989_vm2, %v1659_v39  ;;  %1561 = vmatprep.mubr.msk.f32.mxu0 %vm217_vm1, %v165_v21 }
 0x1f5   :  { %1562 = vmatmul.mubr.msk.f32.vlgmr.msra.gmra.mrb[2].mxu0 %vm217_vm1, %v167_v20 }
 0x253   :  { %v1542_v50 = vpop.f32.mrb[2].mxu1 }
 0x254   :  { %v298_v51 = vadd.f32 %v1542_v50, %v212_v48  ;;  %v292_v52 = vpop.f32.mrb[3].mxu1 }
 0x255   :  { %v293_v53 = vadd.f32 %v292_v52, %v211_v49 }
 0x256   :  { %v566_v54 = vsel %vm562_vm5, %v298_v51, -inf }
 0x257   :  { %567 = vmax.xlane.f32.xlu1 %v566_v54  ;;  %v563_v55 = vsel %vm562_vm5, %v293_v53, -inf }
 0x258   :  { %564 = vmax.xlane.f32.xlu0 %v563_v55 }
 0x2bf   :  { %v1556_v56 = vpop.f32.mrb[4].mxu1 }
 0x2c0   :  { %v1549_v57 = vpop.f32.mrb[0].mxu0  ;;  %v466_v58 = vpop.f32.mrb[5].mxu1  ;;  %v472_v1 = vadd.f32 %v1556_v56, %v212_v48 }
 0x2c1   :  { %v385_v59 = vadd.f32 %v1549_v57, %v212_v48  ;;  %v467_v60 = vadd.f32 %v466_v58, %v211_v49  ;;  %v379_v61 = vpop.f32.mrb[1].mxu0 }
 0x2c2   :  { %v380_v62 = vadd.f32 %v379_v61, %v211_v49  ;;  %v578_v9 = vsel %vm562_vm5, %v472_v1, -inf }
 0x2c3   :  { %v575_v63 = vsel %vm562_vm5, %v467_v60, -inf  ;;  %v572_v0 = vsel %vm562_vm5, %v385_v59, -inf }
 0x2c4   :  { %576 = vmax.xlane.f32.xlu1 %v575_v63  ;;  %573 = vmax.xlane.f32.xlu0 %v572_v0  ;;  %v569_v2 = vsel %vm562_vm5, %v380_v62, -inf }
 0x2c8   :  { %v1563_v3 = vpop.f32.mrb[2].mxu0  ;;  %570 = vmax.xlane.f32.xlu0 %v569_v2 }
 0x2c9   :  { %v553_v4 = vpop.f32.mrb[3].mxu0  ;;  %v559_v8 = vadd.f32 %v1563_v3, %v212_v48 }
 0x2ca   :  { %v2020_v6 = vadd.f32 %v553_v4, %v211_v49 }
 0x2cb   :  { %v584_v11 = vsel %vm562_vm5, %v559_v8, -inf }
 0x2cc   :  { %579 = vmax.xlane.f32.xlu0 %v578_v9  ;;  %v581_v10 = vsel %vm562_vm5, %v2020_v6, -inf }
 0x2cd   :  { %582 = vmax.xlane.f32.xlu1 %v581_v10 }
 0x2d0   :  { %585 = vmax.xlane.f32.xlu0 %v584_v11 }
 0x2de   :  { %1746 = vrot.lane.b32.xlu1 %v1974_v13, %s1861_s2 }
 0x2e4   :  { %v568_v12 = vpop.xlane.xlu1 %567 }
 0x2e5   :  { %v588_v14 = vsub.f32 %v298_v51, %v568_v12  ;;  %v565_v16 = vpop.xlane.xlu0 %564 }
 0x2e6   :  { %v587_v18 = vsub.f32 %v293_v53, %v565_v16 }
 0x2e7   :  { %v597_v15 = vmul.f32 1.442695, %v588_v14 }
 0x2e8   :  { %v595_v20 = vmul.f32 1.442695, %v587_v18 }
 0x2e9   :  { %1765 = vpow2.f32 %v597_v15 }
 0x2ea   :  { %1767 = vpow2.f32 %v595_v20 }
 0x2f3   :  { %v1766_v21 = vpop.eup %1765 }
 0x2f4   :  { %v614_v23 = vsel %vm562_vm5, %v1766_v21, 0.0  ;;  %v1768_v24 = vpop.eup %1767 }
 0x2f5   :  { %615 = vadd.xlane.f32.xlu0 %v614_v23  ;;  %v611_v25 = vsel %vm562_vm5, %v1768_v24, 0.0 }
 0x302   :  { %612 = vadd.xlane.f32.xlu1 %v611_v25 }
 0x351   :  { %v577_v26 = vpop.xlane.xlu1 %576  ;;  %v574_v27 = vpop.xlane.xlu0 %573 }
 0x352   :  { %v590_v28 = vsub.f32 %v385_v59, %v574_v27  ;;  %v591_v13 = vsub.f32 %v467_v60, %v577_v26 }
 0x354   :  { %v601_v29 = vmul.f32 1.442695, %v590_v28  ;;  %v603_v32 = vmul.f32 1.442695, %v591_v13 }
 0x355   :  { %v571_v30 = vpop.xlane.xlu0 %570 }
 0x356   :  { %v589_v31 = vsub.f32 %v380_v62, %v571_v30  ;;  %1769 = vpow2.f32 %v601_v29 }
 0x358   :  { %v599_v33 = vmul.f32 1.442695, %v589_v31 }
 0x359   :  { %v580_v34 = vpop.xlane.xlu0 %579 }
 0x35a   :  { %1771 = vpow2.f32 %v599_v33  ;;  %v592_v35 = vsub.f32 %v472_v1, %v580_v34  ;;  %v583_v36 = vpop.xlane.xlu1 %582 }
 0x35b   :  { %1773 = vpow2.f32 %v603_v32  ;;  %v593_v55 = vsub.f32 %v2020_v6, %v583_v36  ;;  %v1031_v36 = vld [vmem:[%s2168_s3 + $0x8] sm:$0xff] }
 0x35c   :  { %v605_v37 = vmul.f32 1.442695, %v592_v35  ;;  %v1030_v35 = vld [vmem:[%s2168_s3] sm:$0xff] }
 0x35d   :  { %v586_v38 = vpop.xlane.xlu0 %585  ;;  %v607_v57 = vmul.f32 1.442695, %v593_v55 }
 0x35e   :  { %1775 = vpow2.f32 %v605_v37  ;;  %v594_v39 = vsub.f32 %v559_v8, %v586_v38  ;;  %v1747_v40 = vpop.permute.xlu1 %1746  ;;  %v1032_v37 = vld [vmem:[%s2168_s3 + $0x10] sm:$0xff]  ;;  %v1681_v38 = vpack.c.bf16 %v1031_v36, %v1030_v35  ;;  %v1455_v36 = vld [vmem:[%s2174_s9] ss:$0 sm:$0xff] }
 0x35f   :  { %v1749_v41 = vunpack.i.h.bf16 %v1747_v40  ;;  %v1748_v42 = vunpack.i.l.bf16 %v1747_v40 }
 0x360   :  { %v609_v43 = vmul.f32 1.442695, %v594_v39  ;;  %v2030_v44 = vpop.eup %1769  ;;  %v1033_v39 = vld [vmem:[%s2168_s3 + $0x18] sm:$0xff] }
 0x361   :  { %v1665_v45 = vpack.c.bf16 %v1749_v41, %v1748_v42  ;;  %v620_v46 = vsel %vm562_vm5, %v2030_v44, 0.0  ;;  %v1685_v40 = vpack.c.bf16 %v1033_v39, %v1032_v37 }
 0x362   :  { %1777 = vpow2.f32 %v609_v43  ;;  %621 = vadd.xlane.f32.xlu0 %v620_v46 }
 0x363   :  { %1666 = vmatprep.subr.bf16.mxu1 %v1665_v45 }
 0x364   :  { %v1772_v47 = vpop.eup %1771  ;;  %1668 = vmatpush3.bf16.msra.mxu1 %v1665_v45 }
 0x365   :  { %v617_v48 = vsel %vm562_vm5, %v1772_v47, 0.0  ;;  %v1774_v49 = vpop.eup %1773 }
 0x366   :  { %618 = vadd.xlane.f32.xlu1 %v617_v48  ;;  %v623_v51 = vsel %vm562_vm5, %v1774_v49, 0.0 }
 0x368   :  { %v1776_v50 = vpop.eup %1775 }
 0x369   :  { %v626_v52 = vsel %vm562_vm5, %v1776_v50, 0.0 }
 0x36a   :  { %624 = vadd.xlane.f32.xlu1 %v623_v51  ;;  %627 = vadd.xlane.f32.xlu0 %v626_v52 }
 0x36c   :  { %v2037_v53 = vpop.eup %1777 }
 0x36d   :  { %v632_v54 = vsel %vm562_vm5, %v2037_v53, 0.0 }
 0x36e   :  { %633 = vadd.xlane.f32.xlu0 %v632_v54 }
 0x37b   :  { %1756 = vrot.lane.b32.xlu1 %v1978_v17, %s1861_s2 }
 0x382   :  { %v616_v56 = vpop.xlane.xlu0 %615 }
 0x383   :  { %1779 = vrcp.f32 %v616_v56 }
 0x384   :  { %1751 = vrot.lane.b32.xlu0 %v1980_v19, %s1861_s2 }
 0x38d   :  { %v1780_v59 = vpop.eup %1779 }
 0x38e   :  { %v644_v63 = vmul.f32 %v1780_v59, %v1766_v21  ;;  %v1452_v59 = vld [vmem:[%s2169_s4] ss:$0 sm:$0xff] }
 0x38f   :  { %v613_v58 = vpop.xlane.xlu1 %612 }
 0x390   :  { %1781 = vrcp.f32 %v613_v58 }
 0x391   :  { %1783 = vpow2.f32 %v607_v57 }
 0x39a   :  { %v1782_v60 = vpop.eup %1781 }
 0x39b   :  { %v1784_v61 = vpop.eup %1783  ;;  %v643_v62 = vmul.f32 %v1782_v60, %v1768_v24 }
 0x39c   :  { %v629_v17 = vsel %vm562_vm5, %v1784_v61, 0.0 }
 0x39d   :  { %1568 = vmatprep.mubr.msk.f32.mxu1 %vm562_vm5, %v643_v62 }
 0x39e   :  { %1569 = vmatmul.mubr.msk.f32.vlgmr.msra.gmra.mrb[6].mxu1 %vm562_vm5, %v644_v63 }
 0x39f   :  { %630 = vadd.xlane.f32.xlu1 %v629_v17 }
 0x3b0   :  { %1761 = vrot.lane.b32.xlu1 %v1984_v22, %s1861_s2 }
 0x3ef   :  { %v622_v19 = vpop.xlane.xlu0 %621 }
 0x3f3   :  { %v619_v0 = vpop.xlane.xlu1 %618 }
 0x3f4   :  { %1785 = vrcp.f32 %v619_v0 }
 0x3f5   :  { %1787 = vrcp.f32 %v622_v19 }
 0x3f7   :  { %v625_v1 = vpop.xlane.xlu1 %624  ;;  %v628_v2 = vpop.xlane.xlu0 %627 }
 0x3f8   :  { %1789 = vrcp.f32 %v625_v1 }
 0x3f9   :  { %1791 = vrcp.f32 %v628_v2 }
 0x3fb   :  { %v1757_v3 = vpop.permute.xlu1 %1756  ;;  %v634_v4 = vpop.xlane.xlu0 %633 }
 0x3fc   :  { %v1759_v6 = vunpack.i.h.bf16 %v1757_v3  ;;  %v1758_v8 = vunpack.i.l.bf16 %v1757_v3  ;;  %1793 = vrcp.f32 %v634_v4 }
 0x3fe   :  { %v1786_v9 = vpop.eup %1785  ;;  %v1673_v10 = vpack.c.bf16 %v1759_v6, %v1758_v8 }
 0x3ff   :  { %v1752_v11 = vpop.permute.xlu0 %1751  ;;  %v645_v12 = vmul.f32 %v1786_v9, %v1772_v47  ;;  %v1788_v22 = vpop.eup %1787 }
 0x400   :  { %v1754_v14 = vunpack.i.h.bf16 %v1752_v11  ;;  %v1753_v15 = vunpack.i.l.bf16 %v1752_v11  ;;  %1674 = vmatprep.subr.bf16.mxu0 %v1673_v10  ;;  %v646_v24 = vmul.f32 %v1788_v22, %v2030_v44  ;;  %v1171_v22 = vld [vmem:[%s2170_s5 + $0x10] sm:$0xff] }
 0x401   :  { %1575 = vmatprep.mubr.msk.f32.mxu1 %vm562_vm5, %v645_v12  ;;  %1676 = vmatpush3.bf16.msra.mxu0 %v1673_v10 }
 0x402   :  { %v1790_v16 = vpop.eup %1789  ;;  %v1669_v18 = vpack.c.bf16 %v1754_v14, %v1753_v15  ;;  %1682 = vmatprep.subr.bf16.mxu0 %v1681_v38  ;;  %v1170_v14 = vld [vmem:[%s2170_s5 + $0x8] sm:$0xff] }
 0x403   :  { %v1792_v20 = vpop.eup %1791  ;;  %v647_v21 = vmul.f32 %v1790_v16, %v1774_v49  ;;  %v1172_v16 = vld [vmem:[%s2170_s5 + $0x18] sm:$0xff] }
 0x404   :  { %v648_v23 = vmul.f32 %v1792_v20, %v1776_v50  ;;  %1670 = vmatprep.subr.bf16.mxu1 %v1669_v18  ;;  %v1263_v20 = vld [vmem:[%s2172_s7] sm:$0xff] }
 0x405   :  { %1672 = vmatpush3.bf16.msra.mxu1 %v1669_v18  ;;  %1582 = vmatprep.mubr.msk.f32.mxu0 %vm562_vm5, %v647_v21  ;;  %v1693_v18 = vpack.c.bf16 %v1172_v16, %v1171_v22  ;;  %v1264_v21 = vld [vmem:[%s2172_s7 + $0x8] sm:$0xff]  ;;  %v1463_v22 = vld [vmem:[%s2176_s11] ss:$0 sm:$0xff] }
 0x406   :  { %1583 = vmatmul.mubr.msk.f32.vlgmr.msra.gmra.mrb[4].mxu0 %vm562_vm5, %v648_v23  ;;  %v1794_v29 = vpop.eup %1793  ;;  %v1265_v23 = vld [vmem:[%s2172_s7 + $0x10] sm:$0xff] }
 0x407   :  { %v650_v32 = vmul.f32 %v1794_v29, %v2037_v53  ;;  %1684 = vmatpush3.bf16.msra.mxu0 %v1681_v38  ;;  %v1456_v38 = vld [vmem:[%s2175_s10] ss:$0 sm:$0xff] }
 0x408   :  { %1576 = vmatmul.mubr.msk.f32.vlgmr.msra.gmra.mrb[8].mxu1 %vm562_vm5, %v646_v24  ;;  %1686 = vmatprep.subr.bf16.mxu0 %v1685_v40  ;;  %v1697_v24 = vpack.c.bf16 %v1264_v21, %v1263_v20  ;;  %v1464_v21 = vld [vmem:[%s2177_s12] ss:$0 sm:$0xff] }
 0x40b   :  { %1688 = vmatpush3.bf16.msra.mxu0 %v1685_v40 }
 0x40c   :  { %1698 = vmatprep.subr.bf16.mxu0 %v1697_v24 }
 0x42c   :  { %v631_v25 = vpop.xlane.xlu1 %630 }
 0x42d   :  { %1795 = vrcp.f32 %v631_v25  ;;  %v1266_v25 = vld [vmem:[%s2172_s7 + $0x18] sm:$0xff] }
 0x430   :  { %v1762_v26 = vpop.permute.xlu1 %1761 }
 0x431   :  { %v1764_v27 = vunpack.i.h.bf16 %v1762_v26  ;;  %v1763_v28 = vunpack.i.l.bf16 %v1762_v26  ;;  %v1701_v26 = vpack.c.bf16 %v1266_v25, %v1265_v23 }
 0x433   :  { %v1677_v13 = vpack.c.bf16 %v1764_v27, %v1763_v28  ;;  %v1267_v27 = vld [vmem:[%s2172_s7 + $0x20] sm:$0xff]  ;;  %v1268_v28 = vld [vmem:[%s2172_s7 + $0x28] sm:$0xff] }
 0x435   :  { %1678 = vmatprep.subr.bf16.mxu1 %v1677_v13 }
 0x436   :  { %1680 = vmatpush3.bf16.msra.mxu1 %v1677_v13  ;;  %v1705_v13 = vpack.c.bf16 %v1268_v28, %v1267_v27 }
 0x437   :  { %v1796_v30 = vpop.eup %1795 }
 0x438   :  { %v649_v31 = vmul.f32 %v1796_v30, %v1784_v61 }
 0x43a   :  { %1589 = vmatprep.mubr.msk.f32.mxu1 %vm562_vm5, %v649_v31 }
 0x43b   :  { %1590 = vmatmul.mubr.msk.f32.vlgmr.msra.gmra.mrb[10].mxu1 %vm562_vm5, %v650_v32 }
 0x471   :  { %v1570_v33 = vpop.f32.mrb[6].mxu1 }
 0x472   :  { %v729_v34 = vpop.f32.mrb[7].mxu1 }
 0x4d9   :  { %v1584_v41 = vpop.f32.mrb[4].mxu0 }
 0x4da   :  { %v903_v42 = vpop.f32.mrb[5].mxu0 }
 0x4db   :  { %v1577_v43 = vpop.f32.mrb[8].mxu1 }
 0x4dc   :  { %1003 = vrot.lane.b32.xlu1 %v1577_v43, %s1855_s19  ;;  %v816_v44 = vpop.f32.mrb[9].mxu1 }
 0x4dd   :  { %1001 = vrot.lane.b32.xlu0 %v816_v44, %s1855_s19 }
 0x4e0   :  { %1011 = vrot.lane.b32.xlu1 %v1584_v41, %s1862_s28 }
 0x4e1   :  { %1009 = vrot.lane.b32.xlu0 %v903_v42, %s1862_s28 }
 0x50e   :  { %v1591_v45 = vpop.f32.mrb[10].mxu1 }
 0x50f   :  { %1019 = vrot.lane.b32.xlu1 %v1591_v45, %s1863_s29  ;;  %v990_v46 = vpop.f32.mrb[11].mxu1  ;;  %v1269_v45 = vld [vmem:[%s2172_s7 + $0x30] sm:$0xff] }
 0x510   :  { %1017 = vrot.lane.b32.xlu0 %v990_v46, %s1863_s29  ;;  %v1270_v46 = vld [vmem:[%s2172_s7 + $0x38] sm:$0xff] }
 0x54e   :  { %v1004_v47 = vpop.permute.xlu1 %1003 }
 0x54f   :  { %v1002_v48 = vpop.permute.xlu0 %1001  ;;  %v1024_v53 = vsel %vm217_vm1, %v1570_v33, %v1004_v47  ;;  %v1709_v47 = vpack.c.bf16 %v1270_v46, %v1269_v45 }
 0x550   :  { %v1023_v51 = vsel %vm217_vm1, %v729_v34, %v1002_v48  ;;  %v1457_v48 = vld [vmem:[%s2171_s6] ss:$0 sm:$0xff] }
 0x552   :  { %v1012_v49 = vpop.permute.xlu1 %1011 }
 0x553   :  { %v1010_v50 = vpop.permute.xlu0 %1009  ;;  %v1026_v56 = vsel %vm562_vm5, %v1024_v53, %v1012_v49 }
 0x554   :  { %v1025_v54 = vsel %vm562_vm5, %v1023_v51, %v1010_v50 }
 0x581   :  { %v1020_v52 = vpop.permute.xlu1 %1019 }
 0x582   :  { %v1018_v55 = vpop.permute.xlu0 %1017  ;;  %v1029_v58 = vsel %vm1027_vm6, %v1026_v56, %v1020_v52 }
 0x583   :  { %v1028_v57 = vsel %vm1027_vm6, %v1025_v54, %v1018_v55  ;;  %v1460_v55 = vld [vmem:[%s2173_s8] ss:$0 sm:$0xff] }
 0x584   :  { %1600 = vmatprep.mubr.msk.f32.mxu0 %vm72_vm0, %v1028_v57 }
 0x585   :  { %1601 = vmatmul.mubr.msk.f32.vlgmr.msra.gmra.mrb[6].mxu0 %vm72_vm0, %v1029_v58 }
 0x586   :  { %1700 = vmatpush3.bf16.msra.mxu0 %v1697_v24 }
 0x587   :  { %1702 = vmatprep.subr.bf16.mxu0 %v1701_v26 }
 0x58a   :  { %1704 = vmatpush3.bf16.msra.mxu0 %v1701_v26 }
 0x58b   :  { %1706 = vmatprep.subr.bf16.mxu0 %v1705_v13 }
 0x58e   :  { %1708 = vmatpush3.bf16.msra.mxu0 %v1705_v13 }
 0x58f   :  { %1710 = vmatprep.subr.bf16.mxu0 %v1709_v47 }
 0x592   :  { %1712 = vmatpush3.bf16.msra.mxu0 %v1709_v47 }
 0x658   :  { %v1602_v60 = vpop.f32.mrb[6].mxu0 }
 0x659   :  { %v1119_v61 = vadd.f32 %v1602_v60, %v1452_v59  ;;  %v1113_v62 = vpop.f32.mrb[7].mxu0 }
 0x65a   :  { %v1114_v63 = vadd.f32 %v1452_v59, %v1113_v62 }
 0x65b   :  { %v1123_v17 = vadd.f32 %v1119_v61, %v1966_v7 }
 0x65c   :  { %v1122_v19 = vadd.f32 %v1114_v63, %v1962_v5  ;;  %v1169_v5 = vld [vmem:[%s2170_s5] sm:$0xff] }
 0x65d   :  { %v1129_v0 = vsel %vm72_vm0, %v1123_v17, 0.0  ;;  %v1689_v15 = vpack.c.bf16 %v1170_v14, %v1169_v5 }
 0x65e   :  { %1130 = vadd.xlane.f32.xlu1 %v1129_v0  ;;  %v1126_v1 = vsel %vm72_vm0, %v1122_v19, 0.0 }
 0x65f   :  { %1127 = vadd.xlane.f32.xlu0 %v1126_v1  ;;  %1690 = vmatprep.subr.bf16.mxu1 %v1689_v15 }
 0x660   :  { %1692 = vmatpush3.bf16.msra.mxu1 %v1689_v15 }
 0x661   :  { %1694 = vmatprep.subr.bf16.mxu1 %v1693_v18 }
 0x664   :  { %1696 = vmatpush3.bf16.msra.mxu1 %v1693_v18 }
 0x6eb   :  { %v1131_v2 = vpop.xlane.xlu1 %1130 }
 0x6ec   :  { %v1134_v3 = vmul.f32 0.03125, %v1131_v2  ;;  %v1128_v4 = vpop.xlane.xlu0 %1127 }
 0x6ed   :  { %v1133_v6 = vmul.f32 0.03125, %v1128_v4 }
 0x6ee   :  { %v1136_v8 = vsub.f32 %v1123_v17, %v1134_v3 }
 0x6ef   :  { %v1135_v9 = vsub.f32 %v1122_v19, %v1133_v6 }
 0x6f0   :  { %v1138_v12 = vmul.f32 %v1136_v8, %v1136_v8 }
 0x6f1   :  { %v1137_v10 = vmul.f32 %v1135_v9, %v1135_v9 }
 0x6f2   :  { %v1142_v7 = vsel %vm72_vm0, %v1138_v12, 0.0 }
 0x6f3   :  { %v1139_v11 = vsel %vm72_vm0, %v1137_v10, 0.0 }
 0x6f4   :  { %1140 = vadd.xlane.f32.xlu0 %v1139_v11 }
 0x6f8   :  { %1143 = vadd.xlane.f32.xlu0 %v1142_v7 }
 0x781   :  { %v1141_v29 = vpop.xlane.xlu0 %1140 }
 0x782   :  { %v1145_v30 = vmul.f32 0.03125, %v1141_v29 }
 0x784   :  { %v1147_v31 = vadd.f32 1e-06, %v1145_v30 }
 0x785   :  { %v1144_v32 = vpop.xlane.xlu0 %1143 }
 0x786   :  { %1797 = vrsqrt.f32 %v1147_v31  ;;  %v1146_v33 = vmul.f32 0.03125, %v1144_v32 }
 0x788   :  { %v1148_v34 = vadd.f32 1e-06, %v1146_v33 }
 0x78a   :  { %1799 = vrsqrt.f32 %v1148_v34 }
 0x790   :  { %v1798_v35 = vpop.eup %1797 }
 0x791   :  { %v1151_v37 = vmul.f32 %v1798_v35, %v1135_v9 }
 0x793   :  { %v1159_v39 = vmul.f32 %v1455_v36, %v1151_v37 }
 0x794   :  { %v1800_v40 = vpop.eup %1799 }
 0x795   :  { %v1152_v41 = vmul.f32 %v1800_v40, %v1136_v8  ;;  %v1167_v42 = vadd.f32 %v1456_v38, %v1159_v39 }
 0x797   :  { %v1160_v43 = vmul.f32 %v1455_v36, %v1152_v41  ;;  %1611 = vmatprep.mubr.msk.f32.mxu1 %vm72_vm0, %v1167_v42 }
 0x799   :  { %v1168_v44 = vadd.f32 %v1456_v38, %v1160_v43 }
 0x79b   :  { %1612 = vmatmul.mubr.msk.f32.vlgmr.msra.gmra.mrb[12].mxu1 %vm72_vm0, %v1168_v44 }
 0x86e   :  { %v1613_v49 = vpop.f32.mrb[12].mxu1 }
 0x86f   :  { %v1258_v50 = vadd.f32 %v1613_v49, %v1457_v48  ;;  %v1252_v51 = vpop.f32.mrb[13].mxu1 }
 0x870   :  { %v1253_v52 = vadd.f32 %v1457_v48, %v1252_v51 }
 0x871   :  { %v1262_v54 = vmax.f32 %v1258_v50, 0.0 }
 0x872   :  { %v1261_v53 = vmax.f32 %v1253_v52, 0.0 }
 0x874   :  { %1630 = vmatprep.mubr.msk.f32.mxu0 %vm1278_vm7, %v1261_v53 }
 0x875   :  { %1631 = vmatmul.mubr.msk.f32.vlgmr.msra.gmra.mrb[8].mxu0 %vm1278_vm7, %v1262_v54 }
 0x948   :  { %v1632_v56 = vpop.f32.mrb[8].mxu0 }
 0x949   :  { %v1357_v57 = vadd.f32 %v1632_v56, %v1460_v55  ;;  %v1351_v58 = vpop.f32.mrb[9].mxu0 }
 0x94a   :  { %v1352_v59 = vadd.f32 %v1460_v55, %v1351_v58 }
 0x94b   :  { %v1361_v60 = vadd.f32 %v1357_v57, %v1168_v44 }
 0x94c   :  { %v1360_v61 = vadd.f32 %v1352_v59, %v1167_v42 }
 0x94d   :  { %v1367_v62 = vsel %vm72_vm0, %v1361_v60, 0.0 }
 0x94e   :  { %1368 = vadd.xlane.f32.xlu0 %v1367_v62  ;;  %v1364_v63 = vsel %vm72_vm0, %v1360_v61, 0.0 }
 0x94f   :  { %1365 = vadd.xlane.f32.xlu1 %v1364_v63 }
 0x9db   :  { %v1369_v17 = vpop.xlane.xlu0 %1368 }
 0x9dc   :  { %v1371_v19 = vmul.f32 0.03125, %v1369_v17  ;;  %v1366_v0 = vpop.xlane.xlu1 %1365 }
 0x9dd   :  { %v1370_v1 = vmul.f32 0.03125, %v1366_v0 }
 0x9de   :  { %v1373_v2 = vsub.f32 %v1361_v60, %v1371_v19 }
 0x9df   :  { %v1372_v3 = vsub.f32 %v1360_v61, %v1370_v1 }
 0x9e0   :  { %v1375_v4 = vmul.f32 %v1373_v2, %v1373_v2 }
 0x9e1   :  { %v1374_v6 = vmul.f32 %v1372_v3, %v1372_v3 }
 0x9e2   :  { %v1379_v8 = vsel %vm72_vm0, %v1375_v4, 0.0 }
 0x9e3   :  { %1380 = vadd.xlane.f32.xlu0 %v1379_v8  ;;  %v1376_v9 = vsel %vm72_vm0, %v1374_v6, 0.0 }
 0x9e4   :  { %1377 = vadd.xlane.f32.xlu1 %v1376_v9 }
 0xa70   :  { %v1381_v10 = vpop.xlane.xlu0 %1380 }
 0xa71   :  { %v1383_v11 = vmul.f32 0.03125, %v1381_v10  ;;  %v1378_v12 = vpop.xlane.xlu1 %1377 }
 0xa72   :  { %v1382_v7 = vmul.f32 0.03125, %v1378_v12 }
 0xa73   :  { %v1385_v5 = vadd.f32 1e-06, %v1383_v11 }
 0xa74   :  { %v1384_v14 = vadd.f32 1e-06, %v1382_v7 }
 0xa75   :  { %1801 = vrsqrt.f32 %v1385_v5 }
 0xa76   :  { %1803 = vrsqrt.f32 %v1384_v14 }
 0xa7f   :  { %v1802_v15 = vpop.eup %1801 }
 0xa80   :  { %v1804_v16 = vpop.eup %1803  ;;  %v1389_v18 = vmul.f32 %v1802_v15, %v1373_v2 }
 0xa81   :  { %v1388_v20 = vmul.f32 %v1804_v16, %v1372_v3 }
 0xa82   :  { %v1397_v23 = vmul.f32 %v1463_v22, %v1389_v18 }
 0xa83   :  { %v1396_v24 = vmul.f32 %v1463_v22, %v1388_v20 }
 0xa84   :  { %v1405_v25 = vadd.f32 %v1464_v21, %v1397_v23 }
 0xa85   :  { %v1404_v26 = vadd.f32 %v1464_v21, %v1396_v24 }
 0xa86   :  { %1407 = vst.msk [vmem:[#allocation5 + $0x8] sm:$0xff] %vm72_vm0, %v1405_v25 }
 0xa87   :  { %1406 = vst.msk [vmem:[#allocation5] sm:$0xff] %vm72_vm0, %v1404_v26 }
 0xa88   :  { %1838 = shalt.err (!%p1835_p12)
}
 0xa89   :  { %s1839_s24 = scalar_lea.hbm %s2178_s13, 256 }
 0xa8a   :  { %p1840_p13 = scmp.ne.s32.totalorder %s2178_s13, %s1839_s24  ;;  %p1843_p0 = scmp.lt.u32.totalorder %s1839_s24, %s2178_s13 }
 0xa8c   :  { %p1845_p1 = pnand %p1843_p0, %p1840_p13 }
 0xa8e   :  { %1848 = shalt.err (!%p1845_p1)
}
 0xa8f   :  { %1419 = dma.vmem_to_hbm [thread:$0]  %s1414_s22, 256, %s2178_s13, [#allocation4], %s1854_s18, %s1854_s18, %s1855_s19  }
 0xa90   :  { %1851 = dma.done.wait [#allocation4], 256  }
 0xa91   :  { %1852 = vsyncadd [#allocation4], 4294967040 }
 0xa92   :  { %1423 = vsyncpa [#allocation3], 1 }
 0xa93   :  { %1424 = vsyncpa [#allocation4], 1 }

</bundles_post_ra>
